<compile_context>
chip_gen: v5e
topology: v5e:2x2
jax: 0.10.0
libtpu: 0.0.40
codegen_flags: <defaults>
</compile_context>

<pallas_src>
import functools

import jax
import jax.numpy as jnp
from jax import lax
from jax.experimental import pallas as pl
from jax.experimental.pallas import tpu as pltpu


def _round_up(x, m):
    return ((x + m - 1) // m) * m


def _vmem_capacity_bytes():
    # Physical VMEM per TensorCore: v5e/v6e 128 MiB, v7x 64 MiB.
    try:
        return int(pltpu.get_tpu_info().vmem_capacity_bytes)
    except Exception:
        return 64 * 1024 * 1024  # conservative fallback, safe on every generation


def _pad2d(x, rows, cols):
    pr, pc = rows - x.shape[0], cols - x.shape[1]
    if pr == 0 and pc == 0:
        return x  # avoid an extra HBM round-trip when already aligned
    return jnp.pad(x, ((0, pr), (0, pc)))


def _assoc_kernel(xs_ref, xtt_ref, psts_ref, pt_ref, w_acc_ref,
                  *, ns, nt, ns_pad, nt_pad, precise):
    k = pl.program_id(0)

    @pl.when(k == 0)
    def _init():
        w_acc_ref[...] = jnp.zeros_like(w_acc_ref)

    # Hot loop: plain (M, K) @ (K, N) on the MXU (bf16 operands, f32 accumulate).
    w_acc_ref[...] += jnp.dot(xs_ref[...], xtt_ref[...],
                              preferred_element_type=jnp.float32)

    @pl.when(k == pl.num_programs(0) - 1)
    def _epilogue():
        neg = jnp.float32(-1e30)
        op_dtype = jnp.float32 if precise else jnp.bfloat16
        approx = not precise

        W = w_acc_ref[...]  # (ns_pad, nt_pad) f32

        # Mask padded rows / columns so they cannot leak into either softmax.
        # 1-D iotas broadcast inside the select -- no 2-D iota temporaries.
        if ns_pad != ns:
            row_ok = lax.broadcasted_iota(jnp.int32, (ns_pad, 1), 0) < ns
            W = jnp.where(row_ok, W, neg)
        if nt_pad != nt:
            col_ok = lax.broadcasted_iota(jnp.int32, (1, nt_pad), 1) < nt
            W = jnp.where(col_ok, W, neg)

        # Column softmax of W (== Pts stored un-transposed):
        #   C[s, t] = exp(W[s, t] - m_col[t]) / sum_s' exp(W[s', t] - m_col[t])
        # Cast to the Psts operand dtype immediately so the f32 temp dies here.
        m_col = jnp.max(W, axis=0, keepdims=True)
        e_col = jnp.exp(W - m_col)
        inv_col = pl.reciprocal(jnp.sum(e_col, axis=0, keepdims=True),
                                approx=approx)
        c_op = (e_col * inv_col).astype(op_dtype)

        # Row softmax (Pst). Reuse the W scratch in place for exp(W - m_row) so
        # W and e_row never coexist as two separate full-size f32 buffers.
        m_row = jnp.max(W, axis=1, keepdims=True)
        w_acc_ref[...] = jnp.exp(W - m_row)
        e_row = w_acc_ref[...]
        inv_row = pl.reciprocal(jnp.sum(e_row, axis=1, keepdims=True),
                                approx=approx)
        pst = e_row * inv_row

        # Psts[s, s'] = sum_t Pst[s, t] * C[s', t]  (contract the Nt axis of
        # both operands). One-shot MXU matmul in the epilogue.
        psts_ref[...] = lax.dot_general(
            pst.astype(op_dtype), c_op,
            dimension_numbers=(((1,), (1,)), ((), ())),
            preferred_element_type=jnp.float32,
        ).astype(psts_ref.dtype)

        # Pt = mean over the *real* source rows. Padded rows were masked to a
        # constant so their row softmax is exactly uniform 1/nt_pad: remove that
        # contribution in closed form (no masked select, no extra temp).
        col_sum = jnp.sum(pst, axis=0, keepdims=True)
        if ns_pad != ns:
            col_sum = col_sum - jnp.float32((ns_pad - ns) / nt_pad)
        pt_ref[...] = (col_sum * jnp.float32(1.0 / ns)).astype(pt_ref.dtype)


def association_matrix(xs, xt, *, tk=512, precise=False):
    """xs: (Ns, K, ...), xt: (Nt, K, ...) -> (Psts (Ns, Ns), Pt (1, Nt)) in f32."""
    ns, nt = xs.shape[0], xt.shape[0]
    xs2 = xs.reshape(ns, -1)
    xt2 = xt.reshape(nt, -1)
    d = xs2.shape[1]
    assert xt2.shape[1] == d, "xs and xt must share the flattened feature size"
    assert tk % 128 == 0, "tk must be a multiple of 128"

    # Padded sizes.  ns: 16 (bf16 sublane packing) or 128 once a lane-dense Psts
    # store matters; nt: 256 = full MXU width on v6e/v7x; D: multiple of tk.
    ns_pad = _round_up(ns, 128) if ns >= 512 else _round_up(ns, 16)
    nt_pad = _round_up(nt, 256) if nt > 128 else 128
    tk = min(tk, _round_up(d, 128))
    d_pad = _round_up(d, tk)
    num_k = d_pad // tk

    op_bytes = 4 if precise else 2

    # Hot-loop operands: bf16, with xt pre-transposed to (d_pad, nt_pad) so every
    # K step feeds the MXU a plain NN matmul (no transposed-RHS path).
    xs_p = _pad2d(xs2.astype(jnp.bfloat16), ns_pad, d_pad)
    xtt_p = _pad2d(xt2.astype(jnp.bfloat16).T, d_pad, nt_pad)

    # VMEM budget: double-buffered bf16 input tiles + resident f32 W scratch +
    # peak epilogue temporaries + (double-buffered) outputs, with 1.25x margin,
    # clamped to 85% of this generation's physical VMEM.
    inp_tiles = 2 * 2 * (ns_pad + nt_pad) * tk * 2
    w_scratch = ns_pad * nt_pad * 4
    epilogue = ns_pad * nt_pad * (4 + 4 + 2 * op_bytes)
    outs = 2 * (ns_pad * ns_pad + nt_pad) * 4
    need = inp_tiles + w_scratch + epilogue + outs
    vmem_limit = int(min(max(int(1.25 * need), 32 * 1024 * 1024),
                         int(0.85 * _vmem_capacity_bytes())))

    cost = pl.CostEstimate(
        flops=2 * ns_pad * nt_pad * d_pad + 2 * ns_pad * ns_pad * nt_pad,
        transcendentals=2 * ns_pad * nt_pad,
        bytes_accessed=(ns_pad + nt_pad) * d_pad * 2
        + (ns_pad * ns_pad + nt_pad) * 4,
    )

    kernel = functools.partial(_assoc_kernel, ns=ns, nt=nt,
                               ns_pad=ns_pad, nt_pad=nt_pad, precise=precise)

    psts_p, pt_p = pl.pallas_call(
        kernel,
        out_shape=(
            jax.ShapeDtypeStruct((ns_pad, ns_pad), jnp.float32),
            jax.ShapeDtypeStruct((1, nt_pad), jnp.float32),
        ),
        grid_spec=pltpu.PrefetchScalarGridSpec(
            num_scalar_prefetch=0,
            grid=(num_k,),
            in_specs=[
                pl.BlockSpec((ns_pad, tk), lambda k: (0, k)),
                pl.BlockSpec((tk, nt_pad), lambda k: (k, 0)),
            ],
            out_specs=(
                pl.BlockSpec((ns_pad, ns_pad), lambda k: (0, 0)),
                pl.BlockSpec((1, nt_pad), lambda k: (0, 0)),
            ),
            scratch_shapes=[pltpu.VMEM((ns_pad, nt_pad), jnp.float32)],
        ),
        compiler_params=pltpu.CompilerParams(
            dimension_semantics=("arbitrary",),
            vmem_limit_bytes=vmem_limit,
        ),
        cost_estimate=cost,
    )(xs_p, xtt_p)

    return psts_p[:ns, :ns], pt_p[:, :nt]


def _reference(xs, xt):
    ns, nt = xs.shape[0], xt.shape[0]
    xs2 = xs.reshape(ns, -1).astype(jnp.float32)
    xt2 = xt.reshape(nt, -1).astype(jnp.float32)
    W = xs2 @ xt2.T
    Pst = jax.nn.softmax(W, axis=1)
    Pts = jax.nn.softmax(W.T, axis=1)
    return Pst @ Pts, jnp.mean(Pst, axis=0, keepdims=True)


if __name__ == "__main__":
    key = jax.random.PRNGKey(0)
    ks, kt = jax.random.split(key)
    # Small shapes consistent with (N, K, H, W) inputs: D = 4*16*16 = 1024.
    xs = jax.random.normal(ks, (8, 4, 16, 16), dtype=jnp.float32) * 0.1
    xt = jax.random.normal(kt, (16, 4, 16, 16), dtype=jnp.float32) * 0.1

    psts, pt = association_matrix(xs, xt)
    jax.block_until_ready((psts, pt))

    psts_ref, pt_ref = _reference(xs, xt)
    assert psts.shape == (8, 8) and pt.shape == (1, 16)
    # bf16 MXU operands (f32 accumulation) + approx reciprocals -> modest tolerance.
    assert jnp.allclose(psts, psts_ref, atol=2e-2, rtol=2e-2), (
        float(jnp.max(jnp.abs(psts - psts_ref))))
    assert jnp.allclose(pt, pt_ref, atol=2e-2, rtol=2e-2), (
        float(jnp.max(jnp.abs(pt - pt_ref))))

    print("KERNEL_OK")
</pallas_src>

<mosaic_0001>
module attributes {stable_mosaic.version = 11 : i64} {
  func.func @_assoc_kernel(%arg0: i32, %arg1: memref<16x512xbf16, #tpu.memory_space<vmem>>, %arg2: memref<512x128xbf16, #tpu.memory_space<vmem>>, %arg3: memref<16x16xf32, #tpu.memory_space<vmem>>, %arg4: memref<1x128xf32, #tpu.memory_space<vmem>>, %arg5: memref<16x128xf32, #tpu.memory_space<vmem>>) attributes {dimension_semantics = [#tpu.dimension_semantics<arbitrary>], iteration_bounds = array<i64: 2>, scalar_prefetch = 0 : i64, scratch_operands = 1 : i64, tpu.core_type = #tpu.core_type<tc>, window_params = [{transform_indices = @transform_0, window_bounds = array<i64: 16, 512>}, {transform_indices = @transform_1, window_bounds = array<i64: 512, 128>}, {pipeline_mode = #tpu.pipeline_mode<synchronous>, transform_indices = @transform_2, window_bounds = array<i64: 16, 16>}, {pipeline_mode = #tpu.pipeline_mode<synchronous>, transform_indices = @transform_3, window_bounds = array<i64: 1, 128>}]} {
    %c0_i32 = arith.constant 0 : i32
    %0 = arith.cmpi eq, %arg0, %c0_i32 : i32
    %1 = arith.extui %0 : i1 to i32
    %c0_i32_0 = arith.constant 0 : i32
    %2 = arith.cmpi ne, %1, %c0_i32_0 : i32
    scf.if %2 {
      %cst_9 = arith.constant 0.000000e+00 : f32
      %12 = vector.broadcast %cst_9 : f32 to vector<16x128xf32>
      %c0_10 = arith.constant 0 : index
      %c0_11 = arith.constant 0 : index
      %13 = vector.load %arg5[%c0_10, %c0_11] : memref<16x128xf32, #tpu.memory_space<vmem>>, vector<16x128xf32>
      tpu.vector_store %arg5[%c0_10, %c0_11], %12 {strides = array<i32>} : memref<16x128xf32, #tpu.memory_space<vmem>>, vector<16x128xf32>,
    } else {
    }
    %c0 = arith.constant 0 : index
    %c0_1 = arith.constant 0 : index
    %3 = vector.load %arg5[%c0, %c0_1] : memref<16x128xf32, #tpu.memory_space<vmem>>, vector<16x128xf32>
    %c0_2 = arith.constant 0 : index
    %c0_3 = arith.constant 0 : index
    %4 = vector.load %arg1[%c0_2, %c0_3] : memref<16x512xbf16, #tpu.memory_space<vmem>>, vector<16x512xbf16>
    %c0_4 = arith.constant 0 : index
    %c0_5 = arith.constant 0 : index
    %5 = vector.load %arg2[%c0_4, %c0_5] : memref<512x128xbf16, #tpu.memory_space<vmem>>, vector<512x128xbf16>
    %cst = arith.constant dense<0.000000e+00> : vector<16x128xf32>
    %6 = tpu.matmul %4, %5, %cst {dimension_numbers = #tpu.dot_dimension_numbers<[1], [0], [0], [1], [0, 0, 1, 1], [], []>} : vector<16x512xbf16>, vector<512x128xbf16>, vector<16x128xf32> -> vector<16x128xf32>
    %7 = arith.addf %3, %6 : vector<16x128xf32>
    %c0_6 = arith.constant 0 : index
    %c0_7 = arith.constant 0 : index
    %8 = vector.load %arg5[%c0_6, %c0_7] : memref<16x128xf32, #tpu.memory_space<vmem>>, vector<16x128xf32>
    tpu.vector_store %arg5[%c0_6, %c0_7], %7 {strides = array<i32>} : memref<16x128xf32, #tpu.memory_space<vmem>>, vector<16x128xf32>,
    %c1_i32 = arith.constant 1 : i32
    %9 = arith.cmpi eq, %arg0, %c1_i32 : i32
    %10 = arith.extui %9 : i1 to i32
    %c0_i32_8 = arith.constant 0 : i32
    %11 = arith.cmpi ne, %10, %c0_i32_8 : i32
    scf.if %11 {
      %c0_9 = arith.constant 0 : index
      %c0_10 = arith.constant 0 : index
      %12 = vector.load %arg5[%c0_9, %c0_10] : memref<16x128xf32, #tpu.memory_space<vmem>>, vector<16x128xf32>
      %13 = tpu.iota {dimensions = array<i32: 0>} : vector<16x1xi32>
      %c8_i32 = arith.constant 8 : i32
      %14 = vector.broadcast %c8_i32 : i32 to vector<16x1xi32>
      %15 = arith.cmpi slt, %13, %14 : vector<16x1xi32>
      %cst_11 = arith.constant -1.000000e+30 : f32
      %16 = vector.shape_cast %15 : vector<16x1xi1> to vector<16x1xi1>
      %17 = vector.broadcast %16 : vector<16x1xi1> to vector<16x128xi1>
      %18 = vector.broadcast %cst_11 : f32 to vector<16x128xf32>
      %19 = arith.select %17, %12, %18 : vector<16x128xi1>, vector<16x128xf32>
      %20 = tpu.iota {dimensions = array<i32: 1>} : vector<1x128xi32>
      %c16_i32 = arith.constant 16 : i32
      %21 = vector.broadcast %c16_i32 : i32 to vector<1x128xi32>
      %22 = arith.cmpi slt, %20, %21 : vector<1x128xi32>
      %cst_12 = arith.constant -1.000000e+30 : f32
      %23 = vector.shape_cast %22 : vector<1x128xi1> to vector<1x128xi1>
      %24 = vector.broadcast %23 : vector<1x128xi1> to vector<16x128xi1>
      %25 = vector.broadcast %cst_12 : f32 to vector<16x128xf32>
      %26 = arith.select %24, %19, %25 : vector<16x128xi1>, vector<16x128xf32>
      %cst_13 = arith.constant dense<0xFF800000> : vector<128xf32>
      %27 = vector.multi_reduction <maximumf>, %26, %cst_13 [0] : vector<16x128xf32> to vector<128xf32>
      %28 = vector.shape_cast %27 : vector<128xf32> to vector<1x128xf32>
      %29 = vector.broadcast %28 : vector<1x128xf32> to vector<16x128xf32>
      %30 = arith.subf %26, %29 : vector<16x128xf32>
      %31 = math.exp %30 : vector<16x128xf32>
      %cst_14 = arith.constant dense<0.000000e+00> : vector<128xf32>
      %32 = vector.multi_reduction <add>, %31, %cst_14 [0] : vector<16x128xf32> to vector<128xf32>
      %33 = vector.shape_cast %32 : vector<128xf32> to vector<1x128xf32>
      %34 = tpu.reciprocal %33 {approx = true} : vector<1x128xf32> -> vector<1x128xf32>
      %35 = vector.broadcast %34 : vector<1x128xf32> to vector<16x128xf32>
      %36 = arith.mulf %31, %35 : vector<16x128xf32>
      %37 = arith.truncf %36 : vector<16x128xf32> to vector<16x128xbf16>
      %cst_15 = arith.constant dense<0xFF800000> : vector<16xf32>
      %38 = vector.multi_reduction <maximumf>, %26, %cst_15 [1] : vector<16x128xf32> to vector<16xf32>
      %39 = vector.shape_cast %38 : vector<16xf32> to vector<16x1xf32>
      %40 = vector.broadcast %39 : vector<16x1xf32> to vector<16x128xf32>
      %41 = arith.subf %26, %40 : vector<16x128xf32>
      %42 = math.exp %41 : vector<16x128xf32>
      %c0_16 = arith.constant 0 : index
      %c0_17 = arith.constant 0 : index
      %43 = vector.load %arg5[%c0_16, %c0_17] : memref<16x128xf32, #tpu.memory_space<vmem>>, vector<16x128xf32>
      tpu.vector_store %arg5[%c0_16, %c0_17], %42 {strides = array<i32>} : memref<16x128xf32, #tpu.memory_space<vmem>>, vector<16x128xf32>,
      %c0_18 = arith.constant 0 : index
      %c0_19 = arith.constant 0 : index
      %44 = vector.load %arg5[%c0_18, %c0_19] : memref<16x128xf32, #tpu.memory_space<vmem>>, vector<16x128xf32>
      %cst_20 = arith.constant dense<0.000000e+00> : vector<16xf32>
      %45 = vector.multi_reduction <add>, %44, %cst_20 [1] : vector<16x128xf32> to vector<16xf32>
      %46 = vector.shape_cast %45 : vector<16xf32> to vector<16x1xf32>
      %47 = tpu.reciprocal %46 {approx = true} : vector<16x1xf32> -> vector<16x1xf32>
      %48 = vector.broadcast %47 : vector<16x1xf32> to vector<16x128xf32>
      %49 = arith.mulf %44, %48 : vector<16x128xf32>
      %50 = arith.truncf %49 : vector<16x128xf32> to vector<16x128xbf16>
      %cst_21 = arith.constant dense<0.000000e+00> : vector<16x16xf32>
      %51 = tpu.matmul %50, %37, %cst_21 {dimension_numbers = #tpu.dot_dimension_numbers<[1], [1], [0], [0], [0, 0, 1, 0], [], []>} : vector<16x128xbf16>, vector<16x128xbf16>, vector<16x16xf32> -> vector<16x16xf32>
      %c0_22 = arith.constant 0 : index
      %c0_23 = arith.constant 0 : index
      %52 = vector.load %arg3[%c0_22, %c0_23] : memref<16x16xf32, #tpu.memory_space<vmem>>, vector<16x16xf32>
      tpu.vector_store %arg3[%c0_22, %c0_23], %51 {strides = array<i32>} : memref<16x16xf32, #tpu.memory_space<vmem>>, vector<16x16xf32>,
      %cst_24 = arith.constant dense<0.000000e+00> : vector<128xf32>
      %53 = vector.multi_reduction <add>, %49, %cst_24 [0] : vector<16x128xf32> to vector<128xf32>
      %54 = vector.shape_cast %53 : vector<128xf32> to vector<1x128xf32>
      %cst_25 = arith.constant 6.250000e-02 : f32
      %55 = vector.broadcast %cst_25 : f32 to vector<1x128xf32>
      %56 = arith.subf %54, %55 : vector<1x128xf32>
      %cst_26 = arith.constant 1.250000e-01 : f32
      %57 = vector.broadcast %cst_26 : f32 to vector<1x128xf32>
      %58 = arith.mulf %56, %57 : vector<1x128xf32>
      %c0_27 = arith.constant 0 : index
      %c0_28 = arith.constant 0 : index
      %59 = vector.load %arg4[%c0_27, %c0_28] : memref<1x128xf32, #tpu.memory_space<vmem>>, vector<1x128xf32>
      tpu.vector_store %arg4[%c0_27, %c0_28], %58 {strides = array<i32>} : memref<1x128xf32, #tpu.memory_space<vmem>>, vector<1x128xf32>,
    } else {
    }
    return
  }
  func.func @transform_0(%arg0: i32) -> (i32, i32) {
    %c0_i32 = arith.constant 0 : i32
    %c0_i32_0 = arith.constant 0 : i32
    return %c0_i32, %arg0 : i32, i32
  }
  func.func @transform_1(%arg0: i32) -> (i32, i32) {
    %c0_i32 = arith.constant 0 : i32
    %c0_i32_0 = arith.constant 0 : i32
    return %arg0, %c0_i32 : i32, i32
  }
  func.func @transform_2(%arg0: i32) -> (i32, i32) {
    %c0_i32 = arith.constant 0 : i32
    %c0_i32_0 = arith.constant 0 : i32
    %c0_i32_1 = arith.constant 0 : i32
    return %c0_i32, %c0_i32_0 : i32, i32
  }
  func.func @transform_3(%arg0: i32) -> (i32, i32) {
    %c0_i32 = arith.constant 0 : i32
    %c0_i32_0 = arith.constant 0 : i32
    %c0_i32_1 = arith.constant 0 : i32
    return %c0_i32, %c0_i32_0 : i32, i32
  }
}

</mosaic_0001>

<bundles_post_ra>
// kernel: tpu_custom_call.1
= control target key start
LH: loop header
LB: loop body
LE: loop exit
PB: predicated region body
PF: predicated region fallthrough
CT: control target
= control target key end

     0   :  { %9 = vsyncpa [#allocation4], 0  ;;  %s1440_s0 = inlined_call_operand.hbm [shape: bf16[16,1024], index: 0, kind: input, shape index: {}]   ;;  %s1441_s1 = inlined_call_operand.hbm [shape: bf16[1024,128], index: 1, kind: input, shape index: {}]   ;;  %s1442_s2 = inlined_call_operand.hbm [shape: f32[16,16], index: 2, kind: output, shape index: {0}]   ;;  %s1443_s3 = inlined_call_operand.hbm [shape: f32[1,128], index: 3, kind: output, shape index: {1}]  }
   0x1   :  { %11 = vsyncpa [#allocation4 + $0x1], 0 }
   0x2   :  { %12 = vsyncpa [#allocation7], 0 }
   0x3   :  { %14 = vsyncpa [#allocation7 + $0x1], 0 }
   0x4   :  { %15 = vsyncpa [#allocation5], 0 }
   0x5   :  { %16 = vsyncpa [#allocation10], 0  ;;  %s1256_s12 = smov 0   ;;  %s1258_s13 = smov 0  }
   0x6   :  { %s1260_s14 = smov 0   ;;  %s1262_s15 = smov 0  }
   0x7 LB: > { %s1275_s16 = sadd.s32 4294967295, %s1223_s15   ;;  %s1278_s17 = sadd.s32 1, %s1223_s15   ;;  %s1223_s15 = sphi %s1262_s15, %s1451_s15   ;;  %s1219_s14 = sphi %s1260_s14, %s1450_s14   ;;  %s1215_s13 = sphi %s1258_s13, %s1449_s13   ;;  %s1211_s12 = sphi %s1256_s12, %s1448_s12  }
   0x8   : > { %s26_s18 = ssub.s32 %s1223_s15, %s1278_s17  ;;  %s29_s19 = sadd.s32 1, %s1219_s14 }
   0x9   : > { %p27_p0 = scmp.eq.s32.totalorder %s26_s18, 0  ;;  %p36_p1 = scmp.ne.s32.totalorder %s1219_s14, %s1215_s13 }
   0xa   : > { %p37_p2 = scmp.eq.s32.totalorder %s1223_s15, 0  ;;  %p42_p3 = scmp.ne.s32.totalorder %s1215_s13, %s1211_s12 }
   0xb   : > { %s1288_s20 = scalar_select %p27_p0, %s1219_s14, %s29_s19  }
   0xc   : > { %p1290_p4 = por %p37_p2, %p36_p1  ;;  %p43_p5 = scmp.eq.s32.totalorder %s1275_s16, 0 }
   0xd   : > { %p999_p6 = scmp.lt.s32.totalorder %s1223_s15, 2  ;;  %s1301_s23 = sand.u32 1, %s1219_s14  }
   0xe   : > { %p1296_p7 = por %p43_p5, %p42_p3  ;;  %s780_s24 = sshll.u32 %s1301_s23, 5 }
   0xf   : > { %s942_s25 = sshll.u32 %s1223_s15, 4  ;;  %s138_s29 = scalar_lea.vmem [#allocation3], %s780_s24 }
  0x10   : > { %s143_s28 = scalar_lea.hbm %s1440_s0, %s942_s25  ;;  %s146_s30 = sshll.u32 %s138_s29, 4  ;;  %s147_s30 = int_to_ptr.vmem [resolvable:$true] %s146_s30 }
  0x11   : > { %s144_s4 = sshll.u32 %s143_s28, 4  ;;  %p1310_p8 = pnand %p999_p6, %p1290_p4  ;;  %s145_s4 = int_to_ptr.hbm [resolvable:$true] %s144_s4 }
  0x12   : > { %s135_s6 = scalar_lea.sflag [#allocation4], %s1301_s23  ;;  %s1061_s7 = sshra.s32 %s145_s4, 4  ;;  %s1062_s7 = int_to_ptr.hbm [resolvable:$true] %s1061_s7 }
  0x13   : > { %s1063_s8 = scalar_lea.hbm %s1062_s7, 32  ;;  %p1065_p10 = pneg %p1310_p8 }
  0x14   : > { %p1064_p9 = scmp.ne.s32.totalorder %s1062_s7, %s1063_s8  ;;  %s1068_s11 = scalar_lea.hbm %s1440_s0, 64 }
  0x15   : > { %p1069_p13 = scmp.lt.s32.totalorder %s1062_s7, %s1440_s0  ;;  %p1070_p0 = scmp.lt.s32.totalorder %s1068_s11, %s1063_s8 }
  0x16   : > { %p1066_p11 = pnand %p1065_p10, %p1064_p9 }
  0x17   : > { %p1071_p1 = por %p1070_p0, %p1069_p13 }
  0x18   : > { %p1067_p12 = pneg %p1066_p11 }
  0x1a   : > { %p1072_p2 = pnand %p1071_p1, %p1067_p12 }
  0x1c   : > { %1075 = shalt.err (!%p1072_p2)
}
  0x1d   : > { %s1225_s19 = smov 512   ;;  %s1226_s21 = smov 256  }
  0x1e   : > { %s1227_s24 = smov 16   ;;  %p786_p3 = scmp.ge.s32.totalorder %s1223_s15, 1 }
  0x1f   : > { %995 = dma.hbm_to_vmem [thread:$0]  (!%p1310_p8), %s145_s4, 512, %s147_s30, %s135_s6, %s1225_s19, %s1226_s21, %s1227_s24  }
  0x20   : > { %p176_p4 = scmp.lt.s32.totalorder %s1223_s15, 3  ;;  %s783_s25 = sshll.u32 %s1301_s23, 8 }
  0x21   : > { %s943_s27 = sshll.u32 %s1223_s15, 8  ;;  %s160_s28 = scalar_lea.vmem [#allocation6], %s783_s25 }
  0x22   : > { %p1331_p5 = pnand %p786_p3, %p176_p4  ;;  %s168_s29 = sshll.u32 %s160_s28, 4  ;;  %s169_s29 = int_to_ptr.vmem [resolvable:$true] %s168_s29 }
  0x23   : > { %s165_s9 = scalar_lea.hbm %s1441_s1, %s943_s27  ;;  %s157_s11 = scalar_lea.sflag [#allocation7], %s1301_s23 }
  0x24   : > { %s166_s10 = sshll.u32 %s165_s9, 4  ;;  %s1098_s12 = scalar_lea.hbm %s1441_s1, 512  ;;  %s167_s10 = int_to_ptr.hbm [resolvable:$true] %s166_s10 }
  0x25   : > { %s1091_s30 = sshra.s32 %s167_s10, 4  ;;  %s1092_s30 = int_to_ptr.hbm [resolvable:$true] %s1091_s30 }
  0x26   : > { %s1093_s4 = scalar_lea.hbm %s1092_s30, 256  ;;  %p1099_p12 = scmp.lt.s32.totalorder %s1092_s30, %s1441_s1 }
  0x27   : > { %p1094_p6 = scmp.ne.s32.totalorder %s1092_s30, %s1093_s4  ;;  %p1100_p13 = scmp.lt.s32.totalorder %s1098_s12, %s1093_s4 }
  0x29   : > { %p1096_p9 = pnand %p1094_p6, %p1065_p10  ;;  %p1101_p0 = por %p1100_p13, %p1099_p12 }
  0x2b   : > { %p1097_p11 = pneg %p1096_p9 }
  0x2d   : > { %p1102_p1 = pnand %p1101_p0, %p1097_p11 }
  0x2f   : > { %1105 = shalt.err (!%p1102_p1)
}
  0x30   : > { %s1228_s23 = smov 64   ;;  %s1229_s21 = smov 4  }
  0x31   : > { %998 = dma.hbm_to_vmem [thread:$0]  (!%p1310_p8), %s167_s10, 4096, %s169_s29, %s157_s11, %s1228_s23, %s1228_s23, %s1229_s21  }
  0x32   : > { %180 = sbr.rel (%p1331_p5) target bundleno = 664 (0x298), region = 28  ;;  %s182_s24 = sand.u32 (!%p1331_p5), 1, %s1215_s13  }
  0x33   : > { %s787_s25 = sshll.u32 (!%p1331_p5), %s182_s24, 5  ;;  %s183_s27 = scalar_lea.sflag (!%p1331_p5), [#allocation4], %s182_s24 }
  0x34   : > { %s1354_s28 = scalar_lea.vmem (!%p1331_p5), [#allocation3], %s787_s25 }
  0x37   : > { %1194 = dma.done.wait (%p1296_p7), %s183_s27, 512  }
  0x38   : > { %1196 = vsyncadd (%p1296_p7), %s183_s27, 4294966784  ;;  %s788_s7 = sshll.u32 %s182_s24, 8  ;;  %s193_s8 = scalar_lea.sflag [#allocation7], %s182_s24 }
  0x39   : > { %s1360_s5 = scalar_lea.vmem [#allocation6], %s788_s7 }
  0x3a   : > { %1198 = dma.done.wait (%p1296_p7), %s193_s8, 4096  }
  0x3b   : > { %1200 = vsyncadd (%p1296_p7), %s193_s8, 4294963200  ;;  %p789_p8 = scmp.ne.s32.totalorder %s1275_s16, 0 }
  0x3d   : > { %226 = sbr.rel (%p789_p8) target bundleno = 69 (0x45), region = 40 }
  0x42   : > { %v1230_v0 = vmov 0.0  }
  0x43   : > { %227 = vst [vmem:[#allocation2] sm:$0xff] %v1230_v0 }
  0x44   : > { %228 = vst [vmem:[#allocation2 + $0x8] sm:$0xff] %v1230_v0 }
  0x45 PF: > { %v955_v1 = vld [vmem:[%s1360_s5 + $0x38] sm:$0xff]  ;;  %v954_v5 = vld [vmem:[%s1360_s5 + $0x30] sm:$0xff]  ;;  %v953_v9 = vld [vmem:[%s1360_s5 + $0x28] sm:$0xff]  ;;  %p934_p7 = scmp.ne.s32.totalorder %s1275_s16, 1 }
  0x46   : > { %v963_v2 = vld [vmem:[%s1360_s5 + $0x78] sm:$0xff]  ;;  %511 = vmatpush.bf16.msra.mxu0 %v955_v1  ;;  %v962_v6 = vld [vmem:[%s1360_s5 + $0x70] sm:$0xff]  ;;  %v961_v10 = vld [vmem:[%s1360_s5 + $0x68] sm:$0xff] }
  0x47   : > { %v971_v3 = vld [vmem:[%s1360_s5 + $0xb8] sm:$0xff]  ;;  %525 = vmatpush.bf16.msra.mxu1 %v963_v2  ;;  %v970_v7 = vld [vmem:[%s1360_s5 + $0xb0] sm:$0xff]  ;;  %v969_v11 = vld [vmem:[%s1360_s5 + $0xa8] sm:$0xff] }
  0x48   : > { %v979_v4 = vld [vmem:[%s1360_s5 + $0xf8] sm:$0xff]  ;;  %539 = vmatpush.bf16.msra.mxu2 %v971_v3  ;;  %v978_v8 = vld [vmem:[%s1360_s5 + $0xf0] sm:$0xff]  ;;  %v977_v12 = vld [vmem:[%s1360_s5 + $0xe8] sm:$0xff] }
  0x49   : > { %553 = vmatpush.bf16.msra.mxu3 %v979_v4  ;;  %v952_v13 = vld [vmem:[%s1360_s5 + $0x20] sm:$0xff]  ;;  %v951_v17 = vld [vmem:[%s1360_s5 + $0x18] sm:$0xff]  ;;  %v950_v21 = vld [vmem:[%s1360_s5 + $0x10] sm:$0xff] }
  0x4a   : > { %512 = vmatpush.bf16.msra.mxu0 %v954_v5  ;;  %v960_v14 = vld [vmem:[%s1360_s5 + $0x60] sm:$0xff]  ;;  %v959_v18 = vld [vmem:[%s1360_s5 + $0x58] sm:$0xff]  ;;  %v958_v22 = vld [vmem:[%s1360_s5 + $0x50] sm:$0xff] }
  0x4b   : > { %526 = vmatpush.bf16.msra.mxu1 %v962_v6  ;;  %v968_v15 = vld [vmem:[%s1360_s5 + $0xa0] sm:$0xff]  ;;  %v967_v19 = vld [vmem:[%s1360_s5 + $0x98] sm:$0xff]  ;;  %v966_v23 = vld [vmem:[%s1360_s5 + $0x90] sm:$0xff] }
  0x4c   : > { %540 = vmatpush.bf16.msra.mxu2 %v970_v7  ;;  %v976_v16 = vld [vmem:[%s1360_s5 + $0xe0] sm:$0xff]  ;;  %v975_v20 = vld [vmem:[%s1360_s5 + $0xd8] sm:$0xff]  ;;  %v974_v24 = vld [vmem:[%s1360_s5 + $0xd0] sm:$0xff] }
  0x4d   : > { %554 = vmatpush.bf16.msra.mxu3 %v978_v8  ;;  %v949_v25 = vld [vmem:[%s1360_s5 + $0x8] sm:$0xff]  ;;  %v948_v29 = vld [vmem:[%s1360_s5] sm:$0xff]  ;;  %v946_v34 = vld [vmem:[%s1354_s28 + $0xc] sm:$0xf0] }
  0x4e   : > { %513 = vmatpush.bf16.msra.mxu0 %v953_v9  ;;  %v957_v26 = vld [vmem:[%s1360_s5 + $0x48] sm:$0xff]  ;;  %v956_v30 = vld [vmem:[%s1360_s5 + $0x40] sm:$0xff]  ;;  %v794_v36 = vld [vmem:[%s1354_s28 + $0x10] sm:$0xf0] }
  0x4f   : > { %527 = vmatpush.bf16.msra.mxu1 %v961_v10  ;;  %v965_v27 = vld [vmem:[%s1360_s5 + $0x88] sm:$0xff]  ;;  %v964_v31 = vld [vmem:[%s1360_s5 + $0x80] sm:$0xff]  ;;  %v947_v38 = vld [vmem:[%s1354_s28 + $0x14] sm:$0xf0] }
  0x50   : > { %541 = vmatpush.bf16.msra.mxu2 %v969_v11  ;;  %v973_v28 = vld [vmem:[%s1360_s5 + $0xc8] sm:$0xff]  ;;  %v972_v32 = vld [vmem:[%s1360_s5 + $0xc0] sm:$0xff]  ;;  %v802_v40 = vld [vmem:[%s1354_s28 + $0x18] sm:$0xf0] }
  0x51   : > { %555 = vmatpush.bf16.msra.mxu3 %v977_v12  ;;  %v792_v33 = vld [vmem:[%s1354_s28] sm:$0xf]  ;;  %v944_v35 = vld [vmem:[%s1354_s28 + $0x4] sm:$0xf]  ;;  %v800_v37 = vld [vmem:[%s1354_s28 + $0x8] sm:$0xf] }
  0x52   : > { %514 = vmatpush.bf16.msra.mxu0 %v952_v13  ;;  %v945_v39 = vld [vmem:[%s1354_s28 + $0xc] sm:$0xf]  ;;  %v793_v41 = vor.u32 %v946_v34, %v792_v33  ;;  %v797_v42 = vor.u32 %v944_v35, %v794_v36  ;;  %v801_v43 = vor.u32 %v947_v38, %v800_v37  ;;  %v229_v51 = vld [vmem:[#allocation2] sm:$0xff]  ;;  %v230_v59 = vld [vmem:[#allocation2 + $0x8] sm:$0xff] }
  0x53   : > { %528 = vmatpush.bf16.msra.mxu1 %v960_v14  ;;  %v805_v44 = vor.u32 %v945_v39, %v802_v40 }
  0x54   : > { %542 = vmatpush.bf16.msra.mxu2 %v968_v15 }
  0x55   : > { %556 = vmatpush.bf16.msra.mxu3 %v976_v16 }
  0x56   : > { %515 = vmatpush.bf16.msra.mxu0 %v951_v17 }
  0x57   : > { %529 = vmatpush.bf16.msra.mxu1 %v959_v18 }
  0x58   : > { %543 = vmatpush.bf16.msra.mxu2 %v967_v19 }
  0x59   : > { %557 = vmatpush.bf16.msra.mxu3 %v975_v20 }
  0x5a   : > { %516 = vmatpush.bf16.msra.mxu0 %v950_v21 }
  0x5b   : > { %530 = vmatpush.bf16.msra.mxu1 %v958_v22 }
  0x5c   : > { %544 = vmatpush.bf16.msra.mxu2 %v966_v23 }
  0x5d   : > { %558 = vmatpush.bf16.msra.mxu3 %v974_v24 }
  0x5e   : > { %517 = vmatpush.bf16.msra.mxu0 %v949_v25 }
  0x5f   : > { %531 = vmatpush.bf16.msra.mxu1 %v957_v26 }
  0x60   : > { %545 = vmatpush.bf16.msra.mxu2 %v965_v27 }
  0x61   : > { %559 = vmatpush.bf16.msra.mxu3 %v973_v28 }
  0x62   : > { %518 = vmatpush.bf16.msra.mxu0 %v948_v29 }
  0x63   : > { %532 = vmatpush.bf16.msra.mxu1 %v956_v30 }
  0x64   : > { %546 = vmatpush.bf16.msra.mxu2 %v964_v31 }
  0x65   : > { %560 = vmatpush.bf16.msra.mxu3 %v972_v32  ;;  %519 = vmatmul.bf16.vlgmr.msra.gmra.mxu0 %v793_v41 }
  0x66   : > { %533 = vmatmul.bf16.vlgmr.msra.gmra.mxu1 %v797_v42 }
  0x67   : > { %547 = vmatmul.bf16.vlgmr.msra.gmra.mxu2 %v801_v43 }
  0x68   : > { %561 = vmatmul.bf16.vlgmr.msra.gmra.mxu3 %v805_v44 }
  0xe2   : > { %v520_v45 = vpop.f32.mrf.mxu0 }
  0xe3   : > { %v534_v46 = vpop.f32.mrf.mxu1 }
  0xe4   : > { %v535_v47 = vadd.f32 %v534_v46, %v520_v45 }
  0xea   : > { %v548_v48 = vpop.f32.mrf.mxu2  ;;  %v522_v53 = vpop.f32.mrf.mxu0 }
  0xeb   : > { %v562_v49 = vpop.f32.mrf.mxu3  ;;  %v549_v50 = vadd.f32 %v548_v48, %v535_v47  ;;  %v536_v54 = vpop.f32.mrf.mxu1 }
  0xec   : > { %v537_v56 = vadd.f32 %v536_v54, %v522_v53 }
  0xed   : > { %v563_v52 = vadd.f32 %v562_v49, %v549_v50 }
  0xef   : > { %v567_v55 = vadd.f32 %v563_v52, %v229_v51 }
  0xf1   : > { %569 = vst [vmem:[#allocation2] sm:$0xff] %v567_v55 }
  0xf2   : > { %v550_v57 = vpop.f32.mrf.mxu2 }
  0xf3   : > { %v551_v58 = vadd.f32 %v550_v57, %v537_v56  ;;  %v564_v60 = vpop.f32.mrf.mxu3 }
  0xf5   : > { %v565_v61 = vadd.f32 %v564_v60, %v551_v58  ;;  %574 = sbr.rel (%p934_p7) target bundleno = 653 (0x28d), region = 44 }
  0xf7   : > { %v568_v62 = vadd.f32 %v565_v61, %v230_v59 }
  0xf9   : > { %570 = vst [vmem:[#allocation2 + $0x8] sm:$0xff] %v568_v62 }
  0xfa   : > { %v588_v63 = vlaneseq  ;;  %v575_v0 = vld [vmem:[#allocation2] sm:$0xff]  ;;  %v1231_v3 = vmov -1e+30   ;;  %vm656_vm1 = vcmask 130048  }
  0xfc   : > { %v589_v1 = vand.u32 127, %v588_v63 }
  0xfe   : > { %vm590_vm0 = vcmp.lt.s32.totalorder %v589_v1, 16 }
  0xff   : > { %v593_v2 = vsel %vm590_vm0, %v575_v0, -1e+30 }
 0x100   : > { %619 = vmax.xlane.f32.xlu0 %v593_v2  ;;  %v595_v12 = vmax.f32 %v593_v2, -1e+30 }
 0x102   : > { %v596_v13 = vrot.slane %v595_v12, 4 }
 0x104   : > { %v597_v14 = vmax.f32 %v595_v12, %v596_v13 }
 0x106   : > { %v598_v15 = vrot.slane %v597_v14, 2 }
 0x108   : > { %621 = vmax.xlane.f32.xlu0 %v1231_v3  ;;  %v599_v16 = vmax.f32 %v597_v14, %v598_v15 }
 0x10a   : > { %v600_v17 = vrot.slane %v599_v16, 1 }
 0x10c   : > { %v601_v18 = vmax.f32 %v599_v16, %v600_v17 }
 0x10e   : > { %v602_v19 = vsub.f32 %v593_v2, %v601_v18  ;;  %v603_v21 = vsub.f32 -1e+30, %v601_v18 }
 0x110   : > { %v604_v20 = vmul.f32 1.442695, %v602_v19  ;;  %v606_v22 = vmul.f32 1.442695, %v603_v21 }
 0x173   : > { %v620_v4 = vpop.xlane.xlu0 %619 }
 0x174   : > { %v623_v5 = vsub.f32 %v593_v2, %v620_v4 }
 0x176   : > { %v625_v6 = vmul.f32 1.442695, %v623_v5 }
 0x178   : > { %1047 = vpow2.f32 %v625_v6 }
 0x17b   : > { %v622_v7 = vpop.xlane.xlu0 %621 }
 0x17c   : > { %v624_v8 = vsub.f32 -1e+30, %v622_v7 }
 0x17e   : > { %v1048_v9 = vpop.eup %1047  ;;  %v627_v10 = vmul.f32 1.442695, %v624_v8 }
 0x17f   : > { %629 = vst [vmem:[#allocation2] sm:$0xff] %v1048_v9  ;;  %633 = vadd.xlane.f32.xlu1 %v1048_v9 }
 0x180   : > { %1049 = vpow2.f32 %v627_v10 }
 0x181   : > { %1051 = vpow2.f32 %v604_v20 }
 0x182   : > { %1053 = vpow2.f32 %v606_v22 }
 0x186   : > { %v1050_v11 = vpop.eup %1049 }
 0x187   : > { %630 = vst [vmem:[#allocation2 + $0x8] sm:$0xff] %v1050_v11  ;;  %635 = vadd.xlane.f32.xlu1 %v1050_v11  ;;  %v1052_v23 = vpop.eup %1051 }
 0x188   : > { %v1054_v24 = vpop.eup %1053 }
 0x189   : > { %v608_v25 = vadd.f32 %v1054_v24, %v1052_v23 }
 0x18b   : > { %v609_v26 = vrot.slane %v608_v25, 4 }
 0x18d   : > { %v610_v27 = vadd.f32 %v609_v26, %v608_v25 }
 0x18f   : > { %v611_v28 = vrot.slane %v610_v27, 2 }
 0x191   : > { %v612_v29 = vadd.f32 %v611_v28, %v610_v27 }
 0x193   : > { %v613_v30 = vrot.slane %v612_v29, 1 }
 0x195   : > { %v614_v31 = vadd.f32 %v613_v30, %v612_v29 }
 0x197   : > { %1055 = vrcp.f32 %v614_v31 }
 0x19d   : > { %v1056_v32 = vpop.eup %1055 }
 0x19e   : > { %v616_v33 = vmul.f32 %v1056_v32, %v1052_v23  ;;  %v617_v34 = vmul.f32 %v1056_v32, %v1054_v24 }
 0x1a0   : > { %v618_v35 = vpack.c.bf16 %v617_v34, %v616_v33 }
 0x1a2   : > { %649 = vmatpush.bf16.xpose.msra.mxu0 %v618_v35 }
 0x1f2   : > { %v634_v36 = vpop.xlane.xlu1 %633 }
 0x1f3   : > { %1057 = vrcp.f32 %v634_v36 }
 0x1f9   : > { %v1058_v38 = vpop.eup %1057 }
 0x1fa   : > { %v636_v37 = vpop.xlane.xlu1 %635  ;;  %v639_v40 = vmul.f32 %v1058_v38, %v1048_v9 }
 0x1fb   : > { %1059 = vrcp.f32 %v636_v37 }
 0x201   : > { %v1060_v39 = vpop.eup %1059 }
 0x202   : > { %v640_v41 = vmul.f32 %v1060_v39, %v1050_v11 }
 0x204   : > { %v641_v42 = vpack.c.bf16 %v640_v41, %v639_v40  ;;  %v659_v43 = vadd.f32 %v640_v41, %v639_v40 }
 0x206   : > { %650 = vmatmul.bf16.vlgmr.msra.gmra.mxu0 %v641_v42  ;;  %v660_v44 = vrot.slane %v659_v43, 4 }
 0x208   : > { %v661_v45 = vadd.f32 %v660_v44, %v659_v43 }
 0x20a   : > { %v662_v46 = vrot.slane %v661_v45, 2 }
 0x20c   : > { %v663_v47 = vadd.f32 %v662_v46, %v661_v45 }
 0x20e   : > { %v664_v48 = vrot.slane %v663_v47, 1 }
 0x210   : > { %v665_v49 = vadd.f32 %v664_v48, %v663_v47 }
 0x212   : > { %v935_v50 = vadd.f32 -0.0625, %v665_v49 }
 0x214   : > { %v667_v51 = vmul.f32 0.125, %v935_v50 }
 0x216   : > { %668 = vst [vmem:[#allocation9] sm:$0x1] %v667_v51 }
 0x283   : > { %v651_v52 = vpop.f32.mrf.mxu0 }
 0x284   : > { %657 = vst.msk [vmem:[#allocation8] sm:$0xff] %vm656_vm1, %v651_v52 }
 0x28b   : > { %v653_v53 = vpop.f32.mrf.mxu0 }
 0x28c   : > { %658 = vst.msk [vmem:[#allocation8 + $0x8] sm:$0xff] %vm656_vm1, %v653_v53 }
 0x28d PF: > { %p1000_p10 = scmp.eq.s32.totalorder %s1275_s16, 1  ;;  %s1232_s22 = smov [#allocation8]  }
 0x28e   : > { %s674_s26 = sshll.u32 %s1232_s22, 4  ;;  %s676_s10 = sshll.u32 %s1442_s2, 4  ;;  %s675_s26 = int_to_ptr.vmem [resolvable:$true] %s674_s26  ;;  %s677_s10 = int_to_ptr.hbm [resolvable:$true] %s676_s10 }
 0x28f   : > { %s1233_s11 = smov 128   ;;  %s1234_s30 = smov 8  }
 0x290   : > { %985 = dma.vmem_to_hbm [thread:$0]  (%p1000_p10), %s675_s26, 256, %s677_s10, [#allocation5], %s1233_s11, %s1233_s11, %s1234_s30  }
 0x291   : > { %s691_s15 = sshll.u32 %s1443_s3, 4  ;;  %s1235_s12 = smov [#allocation9]   ;;  %s692_s15 = int_to_ptr.hbm [resolvable:$true] %s691_s15 }
 0x292   : > { %s689_s18 = sshll.u32 %s1235_s12, 4  ;;  %s690_s18 = int_to_ptr.vmem [resolvable:$true] %s689_s18 }
 0x293   : > { %987 = dma.vmem_to_hbm [thread:$0]  (%p1000_p10), %s690_s18, 16, %s692_s15, [#allocation10]  }
 0x294   : > { %1202 = dma.done.wait (%p1000_p10), [#allocation5], 256  }
 0x295   : > { %1204 = vsyncadd (%p1000_p10), [#allocation5], 4294967040 }
 0x296   : > { %1206 = dma.done.wait (%p1000_p10), [#allocation10], 16  }
 0x297   : > { %1208 = vsyncadd (%p1000_p10), [#allocation10], 4294967280 }
 0x298 PF: > { %p19_p2 = scmp.ge.s32.totalorder %s1278_s17, 4   ;;  %s1448_s12 = smov %s1215_s13 }
 0x299   : > { %s1449_s13 = smov %s1219_s14  ;;  %s1450_s14 = smov %s1288_s20 }
 0x29a   : > { %s1451_s15 = smov %s1278_s17  ;;  %21 = sbr.rel (!%p19_p2) target bundleno = 7 (0x7), region = 94 }
 0x29f   :  { %710 = vsyncpa [#allocation4], 1 }
 0x2a0   :  { %712 = vsyncpa [#allocation4 + $0x1], 1 }
 0x2a1   :  { %713 = vsyncpa [#allocation7], 1 }
 0x2a2   :  { %715 = vsyncpa [#allocation7 + $0x1], 1 }
 0x2a3   :  { %716 = vsyncpa [#allocation5], 1 }
 0x2a4   :  { %718 = vsyncpa [#allocation5 + $0x1], 1 }
 0x2a5   :  { %719 = vsyncpa [#allocation10], 1 }

</bundles_post_ra>
